<compile_context>
chip_gen: v7x
topology: tpu7x:2x2x1
jax: 0.10.0
libtpu: 0.0.40
codegen_flags: <defaults>
</compile_context>

<pallas_src>
import jax
import jax.numpy as jnp
from jax.experimental import pallas as pl
from jax.experimental.pallas import tpu as pltpu


def conv1x1_kernel(x_ref, wb_ref, o_ref):
    # x_ref : (N, Cin, SUB, 128) f32 VMEM  - one (SUB,128) vreg-block per channel
    # wb_ref: (Cin + 1,)         f32 SMEM  - per-channel weights, then (bias - 0.34)
    # o_ref : (N, SUB, 128)      f32 VMEM  - one full unmasked block per image
    n_img, cin = x_ref.shape[0], x_ref.shape[1]
    for n in range(n_img):                      # trace-time unroll (N is tiny)
        acc = x_ref[n, 0] * wb_ref[0]
        for c in range(1, cin):                 # unrolled scalar-broadcast FMAs (VPU)
            acc = acc + x_ref[n, c] * wb_ref[c]
        o_ref[n] = (acc + wb_ref[cin]).astype(o_ref.dtype)


def model_forward(x_nchw, weight, bias):
    """x_nchw: (N, Cin, H, W); weight: (Cout, Cin) with Cout == 1; bias: (Cout,)."""
    N, Cin, H, W = x_nchw.shape
    Cout = weight.shape[0]
    assert Cout == 1, "kernel is specialized to the module's Conv2d(8, 1, 1)"
    HW = H * W
    assert HW % 128 == 0, "pixel count must be lane-divisible"
    SUB = HW // 128

    # TODO(synk): for large N, tile the batch axis with a 'parallel' grid instead
    # of keeping the whole batch resident (fine here: working set is ~32 KB).
    x4d = x_nchw.reshape(N, Cin, SUB, 128)                 # free reshape (contiguous NCHW)
    # Single SMEM operand: [w_0 ... w_{Cin-1}, bias - 0.34]  (constant folded in).
    wb = jnp.concatenate(
        [weight.reshape(Cin), (bias - 0.34).reshape(1)]).astype(jnp.float32)

    out3d = pl.pallas_call(
        conv1x1_kernel,
        out_shape=jax.ShapeDtypeStruct((N, SUB, 128), x_nchw.dtype),
        in_specs=[
            pl.BlockSpec(memory_space=pltpu.MemorySpace.VMEM),   # whole array is the block
            pl.BlockSpec(memory_space=pltpu.MemorySpace.SMEM),   # 36 bytes of scalars
        ],
        out_specs=pl.BlockSpec(memory_space=pltpu.MemorySpace.VMEM),
    )(x4d, wb)

    # (N, SUB, 128) -> (N, Cout, H, W): row-major order unchanged, free reshape.
    return out3d.reshape(N, Cout, H, W)


if __name__ == "__main__":
    key = jax.random.PRNGKey(0)
    kx, kw, kb = jax.random.split(key, 3)

    # Input per the module: (1, 8, 32, 32), NCHW.
    x = jax.random.normal(kx, (1, 8, 32, 32), dtype=jnp.float32)

    # Deterministic Conv2d(8, 1, kernel_size=1) params (kaiming-uniform-like range).
    cin, cout = 8, 1
    bound = 1.0 / jnp.sqrt(cin * 1 * 1)
    weight = jax.random.uniform(kw, (cout, cin), minval=-bound, maxval=bound,
                                dtype=jnp.float32)
    bias = jax.random.uniform(kb, (cout,), minval=-bound, maxval=bound,
                              dtype=jnp.float32)

    out = model_forward(x, weight, bias)
    jax.block_until_ready(out)

    # Reference check against plain-JAX 1x1 conv semantics.
    ref = jnp.einsum('nchw,oc->nohw', x, weight) + bias.reshape(1, cout, 1, 1) - 0.34
    assert out.shape == (1, 1, 32, 32)
    assert jnp.allclose(out, ref, atol=1e-5, rtol=1e-5)

    print("KERNEL_OK")
</pallas_src>

<mosaic_0001>
module attributes {stable_mosaic.version = 11 : i64} {
  func.func @conv1x1_kernel(%arg0: memref<1x8x8x128xf32, #tpu.memory_space<vmem>>, %arg1: memref<9xf32, #tpu.memory_space<smem>>, %arg2: memref<1x8x128xf32, #tpu.memory_space<vmem>>) attributes {dimension_semantics = [], scalar_prefetch = 0 : i64, scratch_operands = 0 : i64, tpu.core_type = #tpu.core_type<tc>} {
    %c0 = arith.constant 0 : index
    %c0_0 = arith.constant 0 : index
    %c0_1 = arith.constant 0 : index
    %c0_2 = arith.constant 0 : index
    %0 = vector.load %arg0[%c0, %c0_0, %c0_1, %c0_2] : memref<1x8x8x128xf32, #tpu.memory_space<vmem>>, vector<1x1x8x128xf32>
    %1 = vector.shape_cast %0 : vector<1x1x8x128xf32> to vector<8x128xf32>
    %c0_3 = arith.constant 0 : index
    %2 = memref.load %arg1[%c0_3] : memref<9xf32, #tpu.memory_space<smem>>
    %3 = vector.broadcast %2 : f32 to vector<8x128xf32>
    %4 = arith.mulf %1, %3 : vector<8x128xf32>
    %c0_4 = arith.constant 0 : index
    %c1 = arith.constant 1 : index
    %c0_5 = arith.constant 0 : index
    %c0_6 = arith.constant 0 : index
    %5 = vector.load %arg0[%c0_4, %c1, %c0_5, %c0_6] : memref<1x8x8x128xf32, #tpu.memory_space<vmem>>, vector<1x1x8x128xf32>
    %6 = vector.shape_cast %5 : vector<1x1x8x128xf32> to vector<8x128xf32>
    %c1_7 = arith.constant 1 : index
    %7 = memref.load %arg1[%c1_7] : memref<9xf32, #tpu.memory_space<smem>>
    %8 = vector.broadcast %7 : f32 to vector<8x128xf32>
    %9 = arith.mulf %6, %8 : vector<8x128xf32>
    %10 = arith.addf %4, %9 : vector<8x128xf32>
    %c0_8 = arith.constant 0 : index
    %c2 = arith.constant 2 : index
    %c0_9 = arith.constant 0 : index
    %c0_10 = arith.constant 0 : index
    %11 = vector.load %arg0[%c0_8, %c2, %c0_9, %c0_10] : memref<1x8x8x128xf32, #tpu.memory_space<vmem>>, vector<1x1x8x128xf32>
    %12 = vector.shape_cast %11 : vector<1x1x8x128xf32> to vector<8x128xf32>
    %c2_11 = arith.constant 2 : index
    %13 = memref.load %arg1[%c2_11] : memref<9xf32, #tpu.memory_space<smem>>
    %14 = vector.broadcast %13 : f32 to vector<8x128xf32>
    %15 = arith.mulf %12, %14 : vector<8x128xf32>
    %16 = arith.addf %10, %15 : vector<8x128xf32>
    %c0_12 = arith.constant 0 : index
    %c3 = arith.constant 3 : index
    %c0_13 = arith.constant 0 : index
    %c0_14 = arith.constant 0 : index
    %17 = vector.load %arg0[%c0_12, %c3, %c0_13, %c0_14] : memref<1x8x8x128xf32, #tpu.memory_space<vmem>>, vector<1x1x8x128xf32>
    %18 = vector.shape_cast %17 : vector<1x1x8x128xf32> to vector<8x128xf32>
    %c3_15 = arith.constant 3 : index
    %19 = memref.load %arg1[%c3_15] : memref<9xf32, #tpu.memory_space<smem>>
    %20 = vector.broadcast %19 : f32 to vector<8x128xf32>
    %21 = arith.mulf %18, %20 : vector<8x128xf32>
    %22 = arith.addf %16, %21 : vector<8x128xf32>
    %c0_16 = arith.constant 0 : index
    %c4 = arith.constant 4 : index
    %c0_17 = arith.constant 0 : index
    %c0_18 = arith.constant 0 : index
    %23 = vector.load %arg0[%c0_16, %c4, %c0_17, %c0_18] : memref<1x8x8x128xf32, #tpu.memory_space<vmem>>, vector<1x1x8x128xf32>
    %24 = vector.shape_cast %23 : vector<1x1x8x128xf32> to vector<8x128xf32>
    %c4_19 = arith.constant 4 : index
    %25 = memref.load %arg1[%c4_19] : memref<9xf32, #tpu.memory_space<smem>>
    %26 = vector.broadcast %25 : f32 to vector<8x128xf32>
    %27 = arith.mulf %24, %26 : vector<8x128xf32>
    %28 = arith.addf %22, %27 : vector<8x128xf32>
    %c0_20 = arith.constant 0 : index
    %c5 = arith.constant 5 : index
    %c0_21 = arith.constant 0 : index
    %c0_22 = arith.constant 0 : index
    %29 = vector.load %arg0[%c0_20, %c5, %c0_21, %c0_22] : memref<1x8x8x128xf32, #tpu.memory_space<vmem>>, vector<1x1x8x128xf32>
    %30 = vector.shape_cast %29 : vector<1x1x8x128xf32> to vector<8x128xf32>
    %c5_23 = arith.constant 5 : index
    %31 = memref.load %arg1[%c5_23] : memref<9xf32, #tpu.memory_space<smem>>
    %32 = vector.broadcast %31 : f32 to vector<8x128xf32>
    %33 = arith.mulf %30, %32 : vector<8x128xf32>
    %34 = arith.addf %28, %33 : vector<8x128xf32>
    %c0_24 = arith.constant 0 : index
    %c6 = arith.constant 6 : index
    %c0_25 = arith.constant 0 : index
    %c0_26 = arith.constant 0 : index
    %35 = vector.load %arg0[%c0_24, %c6, %c0_25, %c0_26] : memref<1x8x8x128xf32, #tpu.memory_space<vmem>>, vector<1x1x8x128xf32>
    %36 = vector.shape_cast %35 : vector<1x1x8x128xf32> to vector<8x128xf32>
    %c6_27 = arith.constant 6 : index
    %37 = memref.load %arg1[%c6_27] : memref<9xf32, #tpu.memory_space<smem>>
    %38 = vector.broadcast %37 : f32 to vector<8x128xf32>
    %39 = arith.mulf %36, %38 : vector<8x128xf32>
    %40 = arith.addf %34, %39 : vector<8x128xf32>
    %c0_28 = arith.constant 0 : index
    %c7 = arith.constant 7 : index
    %c0_29 = arith.constant 0 : index
    %c0_30 = arith.constant 0 : index
    %41 = vector.load %arg0[%c0_28, %c7, %c0_29, %c0_30] : memref<1x8x8x128xf32, #tpu.memory_space<vmem>>, vector<1x1x8x128xf32>
    %42 = vector.shape_cast %41 : vector<1x1x8x128xf32> to vector<8x128xf32>
    %c7_31 = arith.constant 7 : index
    %43 = memref.load %arg1[%c7_31] : memref<9xf32, #tpu.memory_space<smem>>
    %44 = vector.broadcast %43 : f32 to vector<8x128xf32>
    %45 = arith.mulf %42, %44 : vector<8x128xf32>
    %46 = arith.addf %40, %45 : vector<8x128xf32>
    %c8 = arith.constant 8 : index
    %47 = memref.load %arg1[%c8] : memref<9xf32, #tpu.memory_space<smem>>
    %48 = vector.broadcast %47 : f32 to vector<8x128xf32>
    %49 = arith.addf %46, %48 : vector<8x128xf32>
    %c0_32 = arith.constant 0 : index
    %c0_33 = arith.constant 0 : index
    %c0_34 = arith.constant 0 : index
    %50 = vector.load %arg2[%c0_32, %c0_33, %c0_34] : memref<1x8x128xf32, #tpu.memory_space<vmem>>, vector<1x8x128xf32>
    %51 = vector.shape_cast %50 : vector<1x8x128xf32> to vector<8x128xf32>
    %52 = vector.shape_cast %49 : vector<8x128xf32> to vector<1x8x128xf32>
    tpu.vector_store %arg2[%c0_32, %c0_33, %c0_34], %52 {strides = array<i32>} : memref<1x8x128xf32, #tpu.memory_space<vmem>>, vector<1x8x128xf32>,
    return
  }
}

</mosaic_0001>

<bundles_post_ra>
// kernel: tpu_custom_call.1
= control target key start
LH: loop header
LB: loop body
LE: loop exit
PB: predicated region body
PF: predicated region fallthrough
CT: control target
= control target key end

     0   :  { %7 = vsyncpa [#allocation3], 0  ;;  %s227_s0 = inlined_call_operand.hbm [shape: f32[1,8,8,128], index: 0, kind: input, shape index: {}]   ;;  %s228_s1 = inlined_call_operand.vmem [shape: f32[9], index: 1, kind: input, shape index: {}]   ;;  %s229_s2 = inlined_call_operand.hbm [shape: f32[1,8,128], index: 2, kind: output, shape index: {}]  }
   0x1   :  { %8 = vsyncpa [#allocation5], 0 }
   0x2   :  { %9 = vsyncpa [#allocation4], 0  ;;  %s180_s9 = smov [#allocation2]   ;;  %s28_s13 = sshll.u32 %s228_s1, 4  ;;  %s29_s13 = int_to_ptr.vmem [resolvable:$true] %s28_s13 }
   0x3   :  { %s15_s10 = sshll.u32 %s180_s9, 4  ;;  %s118_s16 = scalar_lea.hbm %s227_s0, 1024  ;;  %s16_s10 = int_to_ptr.vmem [resolvable:$true] %s15_s10 }
   0x4   :  { %p119_p0 = scmp.ne.s32.totalorder %s227_s0, %s118_s16  ;;  %p122_p1 = scmp.lt.u32.totalorder %s118_s16, %s227_s0 }
   0x6   :  { %p124_p2 = pnand %p122_p1, %p119_p0 }
   0x8   :  { %127 = shalt.err (!%p124_p2)
}
   0x9   :  { %s128_s21 = scalar_lea.vmem %s16_s10, 1024  ;;  %p133_p4 = scmp.lt.s32.totalorder %s16_s10, %s16_s10 }
   0xa   :  { %p129_p3 = scmp.ne.s32.totalorder %s16_s10, %s128_s21  ;;  %p134_p5 = scmp.lt.s32.totalorder %s128_s21, %s128_s21 }
   0xc   :  { %p135_p6 = por %p134_p5, %p133_p4 }
   0xe   :  { %p136_p7 = pnand %p135_p6, %p129_p3 }
  0x10   :  { %139 = shalt.err (!%p136_p7)
}
  0x11   :  { %s181_s1 = smov 128   ;;  %s182_s22 = smov 8  }
  0x12   :  { %21 = dma.hbm_to_vmem [thread:$0]  %s227_s0, 1024, %s16_s10, [#allocation3], %s181_s1, %s181_s1, %s182_s22  }
  0x13   :  { %s140_s25 = scalar_lea.vmem %s29_s13, 16  ;;  %p145_p9 = scmp.lt.s32.totalorder %s29_s13, %s29_s13 }
  0x14   :  { %p141_p8 = scmp.ne.s32.totalorder %s29_s13, %s140_s25  ;;  %p146_p10 = scmp.lt.s32.totalorder %s140_s25, %s140_s25 }
  0x16   :  { %p147_p11 = por %p146_p10, %p145_p9 }
  0x18   :  { %p148_p12 = pnand %p147_p11, %p141_p8 }
  0x1a   :  { %151 = shalt.err (!%p148_p12)
}
  0x1b   :  { %s183_s26 = smov [#allocation6]  }
  0x1c   :  { %31 = dma.vmem_to_smem %s29_s13, 16, %s183_s26, [#allocation5]  }
  0x1d   :  { %174 = dma.done.wait [#allocation3], 1024  }
  0x1e   :  { %175 = vsyncadd [#allocation3], 4294966272 }
  0x1f   :  { %176 = dma.done.wait [#allocation5], 16  }
  0x20   :  { %177 = vsyncadd [#allocation5], 4294967280 }
  0x21   :  { %38 = sfence }
  0x22   :  { %s40_s27 = sld [smem:[#allocation6]]  ;;  %s105_s28 = sld [smem:[#allocation6 + $0x1]]  ;;  %v39_v0 = vld [vmem:[#allocation2] sm:$0xff]  ;;  %v44_v1 = vld [vmem:[#allocation2 + $0x8] sm:$0xff]  ;;  %v50_v2 = vld [vmem:[#allocation2 + $0x10] sm:$0xff] }
  0x23   :  { %s106_s29 = sld [smem:[#allocation6 + $0x2]]  ;;  %s107_s30 = sld [smem:[#allocation6 + $0x3]]  ;;  %v56_v5 = vld [vmem:[#allocation2 + $0x18] sm:$0xff]  ;;  %v62_v11 = vld [vmem:[#allocation2 + $0x20] sm:$0xff]  ;;  %v68_v15 = vld [vmem:[#allocation2 + $0x28] sm:$0xff] }
  0x24   :  { %s108_s0 = sld [smem:[#allocation6 + $0x4]]  ;;  %s109_s3 = sld [smem:[#allocation6 + $0x5]]  ;;  %v74_v19 = vld [vmem:[#allocation2 + $0x30] sm:$0xff]  ;;  %v80_v23 = vld [vmem:[#allocation2 + $0x38] sm:$0xff] }
  0x25   :  { %s110_s4 = sld [smem:[#allocation6 + $0x6]]  ;;  %s111_s5 = sld [smem:[#allocation6 + $0x7]] }
  0x26   :  { %s112_s6 = sld [smem:[#allocation6 + $0x8]]  ;;  %s184_s7 = smov [#allocation7]  }
  0x27   :  { %s95_s8 = sshll.u32 %s184_s7, 4  ;;  %s96_s8 = int_to_ptr.vmem [resolvable:$true] %s95_s8 }
  0x28   :  { %v41_v3 = vstv %s40_s27  ;;  %v46_v4 = vstv %s105_s28  ;;  %s152_s9 = scalar_lea.vmem %s96_s8, 128  ;;  %p157_p0 = scmp.lt.s32.totalorder %s96_s8, %s96_s8 }
  0x29   :  { %v42_v6 = vmul.f32 %v41_v3, %v39_v0  ;;  %v47_v7 = vmul.f32 %v46_v4, %v44_v1  ;;  %v52_v8 = vstv %s106_s29  ;;  %v58_v9 = vstv %s107_s30  ;;  %p153_p13 = scmp.ne.s32.totalorder %s96_s8, %s152_s9  ;;  %p158_p1 = scmp.lt.s32.totalorder %s152_s9, %s152_s9 }
  0x2a   :  { %v53_v10 = vmul.f32 %v52_v8, %v50_v2  ;;  %v64_v12 = vstv %s108_s0  ;;  %v59_v14 = vmul.f32 %v58_v9, %v56_v5  ;;  %v70_v16 = vstv %s109_s3 }
  0x2b   :  { %v48_v13 = vadd.f32 %v47_v7, %v42_v6  ;;  %v65_v18 = vmul.f32 %v64_v12, %v62_v11  ;;  %v76_v20 = vstv %s110_s4  ;;  %v71_v22 = vmul.f32 %v70_v16, %v68_v15  ;;  %p159_p2 = por %p158_p1, %p157_p0 }
  0x2c   :  { %v82_v24 = vstv %s111_s5  ;;  %v77_v26 = vmul.f32 %v76_v20, %v74_v19  ;;  %v86_v30 = vstv %s112_s6 }
  0x2d   :  { %v54_v17 = vadd.f32 %v53_v10, %v48_v13  ;;  %v83_v28 = vmul.f32 %v82_v24, %v80_v23  ;;  %p160_p3 = pnand %p159_p2, %p153_p13 }
  0x2f   :  { %v60_v21 = vadd.f32 %v59_v14, %v54_v17 }
  0x31   :  { %v66_v25 = vadd.f32 %v65_v18, %v60_v21 }
  0x33   :  { %v72_v27 = vadd.f32 %v71_v22, %v66_v25 }
  0x35   :  { %v78_v29 = vadd.f32 %v77_v26, %v72_v27 }
  0x37   :  { %v84_v31 = vadd.f32 %v83_v28, %v78_v29 }
  0x39   :  { %v87_v32 = vadd.f32 %v86_v30, %v84_v31 }
  0x3b   :  { %88 = vst [vmem:[#allocation7] sm:$0xff] %v87_v32 }
  0x3c   :  { %163 = shalt.err (!%p160_p3)
}
  0x3d   :  { %s164_s12 = scalar_lea.hbm %s229_s2, 128 }
  0x3e   :  { %p165_p4 = scmp.ne.s32.totalorder %s229_s2, %s164_s12  ;;  %p168_p5 = scmp.lt.u32.totalorder %s164_s12, %s229_s2 }
  0x40   :  { %p170_p6 = pnand %p168_p5, %p165_p4 }
  0x42   :  { %173 = shalt.err (!%p170_p6)
}
  0x43   :  { %98 = dma.vmem_to_hbm [thread:$0]  %s96_s8, 128, %s229_s2, [#allocation4]  }
  0x44   :  { %178 = dma.done.wait [#allocation4], 128  }
  0x45   :  { %179 = vsyncadd [#allocation4], 4294967168 }
  0x46   :  { %102 = vsyncpa [#allocation3], 1 }
  0x47   :  { %103 = vsyncpa [#allocation4], 1 }
  0x48   :  { %104 = vsyncpa [#allocation5], 1 }

</bundles_post_ra>
